<compile_context>
chip_gen: v7x
topology: tpu7x:2x2x1
jax: 0.10.0
libtpu: 0.0.40
codegen_flags: <defaults>
</compile_context>

<pallas_src>
import numpy as np
import jax
import jax.numpy as jnp
from jax.experimental import pallas as pl
from jax.experimental.pallas import tpu as pltpu


def lstm_fc_kernel(x_ref,      # (B*T, D) f32, batch-major rows (row = b*T + t)
                   wih_ref,    # (D, 4H)  bf16  LSTM input weights (transposed; gate order i,f,g,o)
                   whh_ref,    # (H, 4H)  bf16  LSTM recurrent weights (transposed)
                   b_ref,      # (1, 4H)  f32   b_ih + b_hh
                   w1_ref,     # (H, F)   bf16  fc1 weight (transposed)
                   b1_ref,     # (1, F)   f32   fc1 bias
                   w2_ref,     # (1, F)   f32   fc2 weight (PyTorch row layout)
                   b2_ref,     # (1, 1)   f32   fc2 bias
                   out_ref,    # (B, 1)   f32
                   xw_scr):    # (B*T, 4H) f32 VMEM scratch: hoisted input projection
    TB = x_ref.shape[0]
    B = out_ref.shape[0]
    T = TB // B
    H = whh_ref.shape[0]

    # Recurrent weights held in vregs for the whole (unrolled) recurrence.
    whh = whh_ref[...]

    # (1) Hoisted input projection + combined bias for ALL timesteps in a single bf16
    #     MXU matmul, entirely off the serial h->h dependence chain. Rows stay
    #     batch-major (row = b*T + t); the per-step batch slab is fetched below with a
    #     stride-T sublane read -> no XLA transpose dispatch outside the kernel.
    xw_scr[...] = (jnp.dot(x_ref[...].astype(jnp.bfloat16), wih_ref[...],
                           preferred_element_type=jnp.float32)
                   + b_ref[...])

    h = jnp.zeros((B, H), jnp.float32)
    c = jnp.zeros((B, H), jnp.float32)

    # (2) T is a static shape constant -> fully unrolled recurrence; only the
    #     (B,H)@(H,4H) bf16 matmul remains on the serial dependence chain.
    for t in range(T):
        xw_t = xw_scr[pl.ds(t, B, stride=T), :]                     # rows {b*T + t} -> (B, 4H)
        gates = xw_t + jnp.dot(h.astype(jnp.bfloat16), whh,
                               preferred_element_type=jnp.float32)  # (B, 4H) f32

        # (3) Two full 128-lane EUP passes; sigmoid via the tanh identity
        #     (EUP-native on every TPU generation). All VPU/EUP math stays f32.
        sig_all = 0.5 * jnp.tanh(0.5 * gates) + 0.5                 # == sigmoid(gates)
        tanh_all = jnp.tanh(gates)
        i_g = sig_all[:, 0 * H:1 * H]
        f_g = sig_all[:, 1 * H:2 * H]
        g_g = tanh_all[:, 2 * H:3 * H]
        o_g = sig_all[:, 3 * H:4 * H]

        c = f_g * c + i_g * g_g
        h = o_g * jnp.tanh(c)

    # h == lstm_out[:, -1, :] ; dropout(p=0) is the identity.
    z = jnp.dot(h.astype(jnp.bfloat16), w1_ref[...],
                preferred_element_type=jnp.float32) + b1_ref[...]
    z = jnp.maximum(z, 0.0)                                          # ReLU

    # (4) fc2 (F -> 1) as VPU multiply + lane reduction (avoids an N=1 MXU push/drain).
    out_ref[...] = jnp.sum(z * w2_ref[...], axis=-1, keepdims=True) + b2_ref[...]


@jax.jit
def lstm_model_forward(x_btd, params):
    """x_btd: (B, T, D) batch-first float32, matching the PyTorch module."""
    B, T, D = x_btd.shape
    assert B % 8 == 0, "batch must be a multiple of 8 (sublane alignment assumed by the kernel)"
    H = params["whh_t"].shape[0]

    # Contiguous (B,T,D)->(B*T,D) flatten: no dim reordering, so XLA lowers it to a
    # metadata-only bitcast (no extra dispatched copy/transpose kernel).
    x_flat = x_btd.reshape(B * T, D)

    vmem = pl.BlockSpec(memory_space=pltpu.MemorySpace.VMEM)
    return pl.pallas_call(
        lstm_fc_kernel,
        out_shape=jax.ShapeDtypeStruct((B, 1), jnp.float32),
        in_specs=[vmem] * 8,
        out_specs=vmem,
        scratch_shapes=[pltpu.VMEM((B * T, 4 * H), jnp.float32)],
    )(x_flat,
      params["wih_t"], params["whh_t"], params["b"],
      params["w1_t"], params["b1"], params["w2"], params["b2"])


def init_raw_params(key, input_dim, hidden_dim, fc_dim):
    """Deterministic synthetic init in the ORIGINAL PyTorch layouts / ranges."""
    ks = jax.random.split(key, 8)
    k_lstm = 1.0 / np.sqrt(hidden_dim)
    k_fc1 = 1.0 / np.sqrt(hidden_dim)
    k_fc2 = 1.0 / np.sqrt(fc_dim)
    u = lambda k, shape, bound: jax.random.uniform(k, shape, jnp.float32, -bound, bound)
    return {
        "w_ih": u(ks[0], (4 * hidden_dim, input_dim), k_lstm),   # weight_ih_l0
        "w_hh": u(ks[1], (4 * hidden_dim, hidden_dim), k_lstm),  # weight_hh_l0
        "b_ih": u(ks[2], (4 * hidden_dim,), k_lstm),
        "b_hh": u(ks[3], (4 * hidden_dim,), k_lstm),
        "w1":   u(ks[4], (fc_dim, hidden_dim), k_fc1),           # fc1.weight
        "b1":   u(ks[5], (fc_dim,), k_fc1),
        "w2":   u(ks[6], (1, fc_dim), k_fc2),                    # fc2.weight
        "b2":   u(ks[7], (1,), k_fc2),
    }


def prepare_params(raw):
    """One-time (off the hot path) conversion to kernel-ready layouts; MXU operands in bf16."""
    return {
        "wih_t": raw["w_ih"].T.astype(jnp.bfloat16),              # (D, 4H)
        "whh_t": raw["w_hh"].T.astype(jnp.bfloat16),              # (H, 4H)
        "b":     (raw["b_ih"] + raw["b_hh"])[None, :].astype(jnp.float32),   # (1, 4H)
        "w1_t":  raw["w1"].T.astype(jnp.bfloat16),                # (H, F)
        "b1":    raw["b1"][None, :].astype(jnp.float32),          # (1, F)
        "w2":    raw["w2"].astype(jnp.float32),                   # (1, F)
        "b2":    raw["b2"][None, :].astype(jnp.float32),          # (1, 1)
    }


def reference_forward(x_btd, raw):
    """Pure-JAX f32 reference replicating torch.nn.LSTM + fc head from RAW PyTorch weights."""
    B, T, D = x_btd.shape
    H = raw["w_hh"].shape[1]
    h = jnp.zeros((B, H), jnp.float32)
    c = jnp.zeros((B, H), jnp.float32)
    for t in range(T):
        g = (x_btd[:, t, :] @ raw["w_ih"].T + raw["b_ih"]
             + h @ raw["w_hh"].T + raw["b_hh"])
        i_g = jax.nn.sigmoid(g[:, 0 * H:1 * H])
        f_g = jax.nn.sigmoid(g[:, 1 * H:2 * H])
        g_g = jnp.tanh(g[:, 2 * H:3 * H])
        o_g = jax.nn.sigmoid(g[:, 3 * H:4 * H])
        c = f_g * c + i_g * g_g
        h = o_g * jnp.tanh(c)
    z = jnp.maximum(h @ raw["w1"].T + raw["b1"], 0.0)
    return z @ raw["w2"].T + raw["b2"]


if __name__ == "__main__":
    # Small shapes consistent with the module: batch=8, seq=8, input_dim=16, hidden=32, fc=64
    B, T, D, H, F = 8, 8, 16, 32, 64

    key = jax.random.PRNGKey(0)
    kx, kp = jax.random.split(key)
    x = jax.random.normal(kx, (B, T, D), dtype=jnp.float32)
    raw = init_raw_params(kp, D, H, F)
    params = prepare_params(raw)

    out = jax.block_until_ready(lstm_model_forward(x, params))
    ref = reference_forward(x, raw)

    assert out.shape == (B, 1)
    # Tolerance loosened vs. pure-f32: bf16 MXU operands compound rounding over the
    # T-step recurrence (f32 reference).
    np.testing.assert_allclose(np.asarray(out), np.asarray(ref), rtol=5e-2, atol=5e-2)

    print("KERNEL_OK")
</pallas_src>

<mosaic_0001>
module attributes {stable_mosaic.version = 11 : i64} {
  func.func @lstm_fc_kernel(%arg0: memref<64x16xf32, #tpu.memory_space<vmem>>, %arg1: memref<16x128xbf16, #tpu.memory_space<vmem>>, %arg2: memref<32x128xbf16, #tpu.memory_space<vmem>>, %arg3: memref<1x128xf32, #tpu.memory_space<vmem>>, %arg4: memref<32x64xbf16, #tpu.memory_space<vmem>>, %arg5: memref<1x64xf32, #tpu.memory_space<vmem>>, %arg6: memref<1x64xf32, #tpu.memory_space<vmem>>, %arg7: memref<1x1xf32, #tpu.memory_space<vmem>>, %arg8: memref<8x1xf32, #tpu.memory_space<vmem>>, %arg9: memref<64x128xf32, #tpu.memory_space<vmem>>) attributes {dimension_semantics = [], scalar_prefetch = 0 : i64, scratch_operands = 1 : i64, tpu.core_type = #tpu.core_type<tc>} {
    %c0 = arith.constant 0 : index
    %c0_0 = arith.constant 0 : index
    %0 = vector.load %arg2[%c0, %c0_0] : memref<32x128xbf16, #tpu.memory_space<vmem>>, vector<32x128xbf16>
    %c0_1 = arith.constant 0 : index
    %c0_2 = arith.constant 0 : index
    %1 = vector.load %arg0[%c0_1, %c0_2] : memref<64x16xf32, #tpu.memory_space<vmem>>, vector<64x16xf32>
    %2 = arith.truncf %1 : vector<64x16xf32> to vector<64x16xbf16>
    %c0_3 = arith.constant 0 : index
    %c0_4 = arith.constant 0 : index
    %3 = vector.load %arg1[%c0_3, %c0_4] : memref<16x128xbf16, #tpu.memory_space<vmem>>, vector<16x128xbf16>
    %cst = arith.constant dense<0.000000e+00> : vector<64x128xf32>
    %4 = tpu.matmul %2, %3, %cst {dimension_numbers = #tpu.dot_dimension_numbers<[1], [0], [0], [1], [0, 0, 1, 1], [], []>} : vector<64x16xbf16>, vector<16x128xbf16>, vector<64x128xf32> -> vector<64x128xf32>
    %c0_5 = arith.constant 0 : index
    %c0_6 = arith.constant 0 : index
    %5 = vector.load %arg3[%c0_5, %c0_6] : memref<1x128xf32, #tpu.memory_space<vmem>>, vector<1x128xf32>
    %6 = vector.broadcast %5 : vector<1x128xf32> to vector<64x128xf32>
    %7 = arith.addf %4, %6 : vector<64x128xf32>
    %c0_7 = arith.constant 0 : index
    %c0_8 = arith.constant 0 : index
    %8 = vector.load %arg9[%c0_7, %c0_8] : memref<64x128xf32, #tpu.memory_space<vmem>>, vector<64x128xf32>
    tpu.vector_store %arg9[%c0_7, %c0_8], %7 {strides = array<i32>} : memref<64x128xf32, #tpu.memory_space<vmem>>, vector<64x128xf32>,
    %cst_9 = arith.constant 0.000000e+00 : f32
    %9 = vector.broadcast %cst_9 : f32 to vector<8x32xf32>
    %cst_10 = arith.constant 0.000000e+00 : f32
    %10 = vector.broadcast %cst_10 : f32 to vector<8x32xf32>
    %c0_11 = arith.constant 0 : index
    %c0_12 = arith.constant 0 : index
    %11 = tpu.strided_load %arg9[%c0_11, %c0_12] {strides = array<i32: 8, 1>} : memref<64x128xf32, #tpu.memory_space<vmem>>, vector<8x128xf32>
    %12 = arith.truncf %9 : vector<8x32xf32> to vector<8x32xbf16>
    %cst_13 = arith.constant dense<0.000000e+00> : vector<8x128xf32>
    %13 = tpu.matmul %12, %0, %cst_13 {dimension_numbers = #tpu.dot_dimension_numbers<[1], [0], [0], [1], [0, 0, 1, 1], [], []>} : vector<8x32xbf16>, vector<32x128xbf16>, vector<8x128xf32> -> vector<8x128xf32>
    %14 = arith.addf %11, %13 : vector<8x128xf32>
    %cst_14 = arith.constant 5.000000e-01 : f32
    %15 = vector.broadcast %cst_14 : f32 to vector<8x128xf32>
    %16 = arith.mulf %15, %14 : vector<8x128xf32>
    %17 = math.tanh %16 : vector<8x128xf32>
    %cst_15 = arith.constant 5.000000e-01 : f32
    %18 = vector.broadcast %cst_15 : f32 to vector<8x128xf32>
    %19 = arith.mulf %18, %17 : vector<8x128xf32>
    %cst_16 = arith.constant 5.000000e-01 : f32
    %20 = vector.broadcast %cst_16 : f32 to vector<8x128xf32>
    %21 = arith.addf %19, %20 : vector<8x128xf32>
    %22 = math.tanh %14 : vector<8x128xf32>
    %23 = vector.extract_strided_slice %21 {offsets = [0, 0], sizes = [8, 32], strides = [1, 1]} : vector<8x128xf32> to vector<8x32xf32>
    %24 = vector.extract_strided_slice %21 {offsets = [0, 32], sizes = [8, 32], strides = [1, 1]} : vector<8x128xf32> to vector<8x32xf32>
    %25 = vector.extract_strided_slice %22 {offsets = [0, 64], sizes = [8, 32], strides = [1, 1]} : vector<8x128xf32> to vector<8x32xf32>
    %26 = vector.extract_strided_slice %21 {offsets = [0, 96], sizes = [8, 32], strides = [1, 1]} : vector<8x128xf32> to vector<8x32xf32>
    %27 = arith.mulf %24, %10 : vector<8x32xf32>
    %28 = arith.mulf %23, %25 : vector<8x32xf32>
    %29 = arith.addf %27, %28 : vector<8x32xf32>
    %30 = math.tanh %29 : vector<8x32xf32>
    %31 = arith.mulf %26, %30 : vector<8x32xf32>
    %c1 = arith.constant 1 : index
    %c0_17 = arith.constant 0 : index
    %32 = tpu.strided_load %arg9[%c1, %c0_17] {strides = array<i32: 8, 1>} : memref<64x128xf32, #tpu.memory_space<vmem>>, vector<8x128xf32>
    %33 = arith.truncf %31 : vector<8x32xf32> to vector<8x32xbf16>
    %cst_18 = arith.constant dense<0.000000e+00> : vector<8x128xf32>
    %34 = tpu.matmul %33, %0, %cst_18 {dimension_numbers = #tpu.dot_dimension_numbers<[1], [0], [0], [1], [0, 0, 1, 1], [], []>} : vector<8x32xbf16>, vector<32x128xbf16>, vector<8x128xf32> -> vector<8x128xf32>
    %35 = arith.addf %32, %34 : vector<8x128xf32>
    %cst_19 = arith.constant 5.000000e-01 : f32
    %36 = vector.broadcast %cst_19 : f32 to vector<8x128xf32>
    %37 = arith.mulf %36, %35 : vector<8x128xf32>
    %38 = math.tanh %37 : vector<8x128xf32>
    %cst_20 = arith.constant 5.000000e-01 : f32
    %39 = vector.broadcast %cst_20 : f32 to vector<8x128xf32>
    %40 = arith.mulf %39, %38 : vector<8x128xf32>
    %cst_21 = arith.constant 5.000000e-01 : f32
    %41 = vector.broadcast %cst_21 : f32 to vector<8x128xf32>
    %42 = arith.addf %40, %41 : vector<8x128xf32>
    %43 = math.tanh %35 : vector<8x128xf32>
    %44 = vector.extract_strided_slice %42 {offsets = [0, 0], sizes = [8, 32], strides = [1, 1]} : vector<8x128xf32> to vector<8x32xf32>
    %45 = vector.extract_strided_slice %42 {offsets = [0, 32], sizes = [8, 32], strides = [1, 1]} : vector<8x128xf32> to vector<8x32xf32>
    %46 = vector.extract_strided_slice %43 {offsets = [0, 64], sizes = [8, 32], strides = [1, 1]} : vector<8x128xf32> to vector<8x32xf32>
    %47 = vector.extract_strided_slice %42 {offsets = [0, 96], sizes = [8, 32], strides = [1, 1]} : vector<8x128xf32> to vector<8x32xf32>
    %48 = arith.mulf %45, %29 : vector<8x32xf32>
    %49 = arith.mulf %44, %46 : vector<8x32xf32>
    %50 = arith.addf %48, %49 : vector<8x32xf32>
    %51 = math.tanh %50 : vector<8x32xf32>
    %52 = arith.mulf %47, %51 : vector<8x32xf32>
    %c2 = arith.constant 2 : index
    %c0_22 = arith.constant 0 : index
    %53 = tpu.strided_load %arg9[%c2, %c0_22] {strides = array<i32: 8, 1>} : memref<64x128xf32, #tpu.memory_space<vmem>>, vector<8x128xf32>
    %54 = arith.truncf %52 : vector<8x32xf32> to vector<8x32xbf16>
    %cst_23 = arith.constant dense<0.000000e+00> : vector<8x128xf32>
    %55 = tpu.matmul %54, %0, %cst_23 {dimension_numbers = #tpu.dot_dimension_numbers<[1], [0], [0], [1], [0, 0, 1, 1], [], []>} : vector<8x32xbf16>, vector<32x128xbf16>, vector<8x128xf32> -> vector<8x128xf32>
    %56 = arith.addf %53, %55 : vector<8x128xf32>
    %cst_24 = arith.constant 5.000000e-01 : f32
    %57 = vector.broadcast %cst_24 : f32 to vector<8x128xf32>
    %58 = arith.mulf %57, %56 : vector<8x128xf32>
    %59 = math.tanh %58 : vector<8x128xf32>
    %cst_25 = arith.constant 5.000000e-01 : f32
    %60 = vector.broadcast %cst_25 : f32 to vector<8x128xf32>
    %61 = arith.mulf %60, %59 : vector<8x128xf32>
    %cst_26 = arith.constant 5.000000e-01 : f32
    %62 = vector.broadcast %cst_26 : f32 to vector<8x128xf32>
    %63 = arith.addf %61, %62 : vector<8x128xf32>
    %64 = math.tanh %56 : vector<8x128xf32>
    %65 = vector.extract_strided_slice %63 {offsets = [0, 0], sizes = [8, 32], strides = [1, 1]} : vector<8x128xf32> to vector<8x32xf32>
    %66 = vector.extract_strided_slice %63 {offsets = [0, 32], sizes = [8, 32], strides = [1, 1]} : vector<8x128xf32> to vector<8x32xf32>
    %67 = vector.extract_strided_slice %64 {offsets = [0, 64], sizes = [8, 32], strides = [1, 1]} : vector<8x128xf32> to vector<8x32xf32>
    %68 = vector.extract_strided_slice %63 {offsets = [0, 96], sizes = [8, 32], strides = [1, 1]} : vector<8x128xf32> to vector<8x32xf32>
    %69 = arith.mulf %66, %50 : vector<8x32xf32>
    %70 = arith.mulf %65, %67 : vector<8x32xf32>
    %71 = arith.addf %69, %70 : vector<8x32xf32>
    %72 = math.tanh %71 : vector<8x32xf32>
    %73 = arith.mulf %68, %72 : vector<8x32xf32>
    %c3 = arith.constant 3 : index
    %c0_27 = arith.constant 0 : index
    %74 = tpu.strided_load %arg9[%c3, %c0_27] {strides = array<i32: 8, 1>} : memref<64x128xf32, #tpu.memory_space<vmem>>, vector<8x128xf32>
    %75 = arith.truncf %73 : vector<8x32xf32> to vector<8x32xbf16>
    %cst_28 = arith.constant dense<0.000000e+00> : vector<8x128xf32>
    %76 = tpu.matmul %75, %0, %cst_28 {dimension_numbers = #tpu.dot_dimension_numbers<[1], [0], [0], [1], [0, 0, 1, 1], [], []>} : vector<8x32xbf16>, vector<32x128xbf16>, vector<8x128xf32> -> vector<8x128xf32>
    %77 = arith.addf %74, %76 : vector<8x128xf32>
    %cst_29 = arith.constant 5.000000e-01 : f32
    %78 = vector.broadcast %cst_29 : f32 to vector<8x128xf32>
    %79 = arith.mulf %78, %77 : vector<8x128xf32>
    %80 = math.tanh %79 : vector<8x128xf32>
    %cst_30 = arith.constant 5.000000e-01 : f32
    %81 = vector.broadcast %cst_30 : f32 to vector<8x128xf32>
    %82 = arith.mulf %81, %80 : vector<8x128xf32>
    %cst_31 = arith.constant 5.000000e-01 : f32
    %83 = vector.broadcast %cst_31 : f32 to vector<8x128xf32>
    %84 = arith.addf %82, %83 : vector<8x128xf32>
    %85 = math.tanh %77 : vector<8x128xf32>
    %86 = vector.extract_strided_slice %84 {offsets = [0, 0], sizes = [8, 32], strides = [1, 1]} : vector<8x128xf32> to vector<8x32xf32>
    %87 = vector.extract_strided_slice %84 {offsets = [0, 32], sizes = [8, 32], strides = [1, 1]} : vector<8x128xf32> to vector<8x32xf32>
    %88 = vector.extract_strided_slice %85 {offsets = [0, 64], sizes = [8, 32], strides = [1, 1]} : vector<8x128xf32> to vector<8x32xf32>
    %89 = vector.extract_strided_slice %84 {offsets = [0, 96], sizes = [8, 32], strides = [1, 1]} : vector<8x128xf32> to vector<8x32xf32>
    %90 = arith.mulf %87, %71 : vector<8x32xf32>
    %91 = arith.mulf %86, %88 : vector<8x32xf32>
    %92 = arith.addf %90, %91 : vector<8x32xf32>
    %93 = math.tanh %92 : vector<8x32xf32>
    %94 = arith.mulf %89, %93 : vector<8x32xf32>
    %c4 = arith.constant 4 : index
    %c0_32 = arith.constant 0 : index
    %95 = tpu.strided_load %arg9[%c4, %c0_32] {strides = array<i32: 8, 1>} : memref<64x128xf32, #tpu.memory_space<vmem>>, vector<8x128xf32>
    %96 = arith.truncf %94 : vector<8x32xf32> to vector<8x32xbf16>
    %cst_33 = arith.constant dense<0.000000e+00> : vector<8x128xf32>
    %97 = tpu.matmul %96, %0, %cst_33 {dimension_numbers = #tpu.dot_dimension_numbers<[1], [0], [0], [1], [0, 0, 1, 1], [], []>} : vector<8x32xbf16>, vector<32x128xbf16>, vector<8x128xf32> -> vector<8x128xf32>
    %98 = arith.addf %95, %97 : vector<8x128xf32>
    %cst_34 = arith.constant 5.000000e-01 : f32
    %99 = vector.broadcast %cst_34 : f32 to vector<8x128xf32>
    %100 = arith.mulf %99, %98 : vector<8x128xf32>
    %101 = math.tanh %100 : vector<8x128xf32>
    %cst_35 = arith.constant 5.000000e-01 : f32
    %102 = vector.broadcast %cst_35 : f32 to vector<8x128xf32>
    %103 = arith.mulf %102, %101 : vector<8x128xf32>
    %cst_36 = arith.constant 5.000000e-01 : f32
    %104 = vector.broadcast %cst_36 : f32 to vector<8x128xf32>
    %105 = arith.addf %103, %104 : vector<8x128xf32>
    %106 = math.tanh %98 : vector<8x128xf32>
    %107 = vector.extract_strided_slice %105 {offsets = [0, 0], sizes = [8, 32], strides = [1, 1]} : vector<8x128xf32> to vector<8x32xf32>
    %108 = vector.extract_strided_slice %105 {offsets = [0, 32], sizes = [8, 32], strides = [1, 1]} : vector<8x128xf32> to vector<8x32xf32>
    %109 = vector.extract_strided_slice %106 {offsets = [0, 64], sizes = [8, 32], strides = [1, 1]} : vector<8x128xf32> to vector<8x32xf32>
    %110 = vector.extract_strided_slice %105 {offsets = [0, 96], sizes = [8, 32], strides = [1, 1]} : vector<8x128xf32> to vector<8x32xf32>
    %111 = arith.mulf %108, %92 : vector<8x32xf32>
    %112 = arith.mulf %107, %109 : vector<8x32xf32>
    %113 = arith.addf %111, %112 : vector<8x32xf32>
    %114 = math.tanh %113 : vector<8x32xf32>
    %115 = arith.mulf %110, %114 : vector<8x32xf32>
    %c5 = arith.constant 5 : index
    %c0_37 = arith.constant 0 : index
    %116 = tpu.strided_load %arg9[%c5, %c0_37] {strides = array<i32: 8, 1>} : memref<64x128xf32, #tpu.memory_space<vmem>>, vector<8x128xf32>
    %117 = arith.truncf %115 : vector<8x32xf32> to vector<8x32xbf16>
    %cst_38 = arith.constant dense<0.000000e+00> : vector<8x128xf32>
    %118 = tpu.matmul %117, %0, %cst_38 {dimension_numbers = #tpu.dot_dimension_numbers<[1], [0], [0], [1], [0, 0, 1, 1], [], []>} : vector<8x32xbf16>, vector<32x128xbf16>, vector<8x128xf32> -> vector<8x128xf32>
    %119 = arith.addf %116, %118 : vector<8x128xf32>
    %cst_39 = arith.constant 5.000000e-01 : f32
    %120 = vector.broadcast %cst_39 : f32 to vector<8x128xf32>
    %121 = arith.mulf %120, %119 : vector<8x128xf32>
    %122 = math.tanh %121 : vector<8x128xf32>
    %cst_40 = arith.constant 5.000000e-01 : f32
    %123 = vector.broadcast %cst_40 : f32 to vector<8x128xf32>
    %124 = arith.mulf %123, %122 : vector<8x128xf32>
    %cst_41 = arith.constant 5.000000e-01 : f32
    %125 = vector.broadcast %cst_41 : f32 to vector<8x128xf32>
    %126 = arith.addf %124, %125 : vector<8x128xf32>
    %127 = math.tanh %119 : vector<8x128xf32>
    %128 = vector.extract_strided_slice %126 {offsets = [0, 0], sizes = [8, 32], strides = [1, 1]} : vector<8x128xf32> to vector<8x32xf32>
    %129 = vector.extract_strided_slice %126 {offsets = [0, 32], sizes = [8, 32], strides = [1, 1]} : vector<8x128xf32> to vector<8x32xf32>
    %130 = vector.extract_strided_slice %127 {offsets = [0, 64], sizes = [8, 32], strides = [1, 1]} : vector<8x128xf32> to vector<8x32xf32>
    %131 = vector.extract_strided_slice %126 {offsets = [0, 96], sizes = [8, 32], strides = [1, 1]} : vector<8x128xf32> to vector<8x32xf32>
    %132 = arith.mulf %129, %113 : vector<8x32xf32>
    %133 = arith.mulf %128, %130 : vector<8x32xf32>
    %134 = arith.addf %132, %133 : vector<8x32xf32>
    %135 = math.tanh %134 : vector<8x32xf32>
    %136 = arith.mulf %131, %135 : vector<8x32xf32>
    %c6 = arith.constant 6 : index
    %c0_42 = arith.constant 0 : index
    %137 = tpu.strided_load %arg9[%c6, %c0_42] {strides = array<i32: 8, 1>} : memref<64x128xf32, #tpu.memory_space<vmem>>, vector<8x128xf32>
    %138 = arith.truncf %136 : vector<8x32xf32> to vector<8x32xbf16>
    %cst_43 = arith.constant dense<0.000000e+00> : vector<8x128xf32>
    %139 = tpu.matmul %138, %0, %cst_43 {dimension_numbers = #tpu.dot_dimension_numbers<[1], [0], [0], [1], [0, 0, 1, 1], [], []>} : vector<8x32xbf16>, vector<32x128xbf16>, vector<8x128xf32> -> vector<8x128xf32>
    %140 = arith.addf %137, %139 : vector<8x128xf32>
    %cst_44 = arith.constant 5.000000e-01 : f32
    %141 = vector.broadcast %cst_44 : f32 to vector<8x128xf32>
    %142 = arith.mulf %141, %140 : vector<8x128xf32>
    %143 = math.tanh %142 : vector<8x128xf32>
    %cst_45 = arith.constant 5.000000e-01 : f32
    %144 = vector.broadcast %cst_45 : f32 to vector<8x128xf32>
    %145 = arith.mulf %144, %143 : vector<8x128xf32>
    %cst_46 = arith.constant 5.000000e-01 : f32
    %146 = vector.broadcast %cst_46 : f32 to vector<8x128xf32>
    %147 = arith.addf %145, %146 : vector<8x128xf32>
    %148 = math.tanh %140 : vector<8x128xf32>
    %149 = vector.extract_strided_slice %147 {offsets = [0, 0], sizes = [8, 32], strides = [1, 1]} : vector<8x128xf32> to vector<8x32xf32>
    %150 = vector.extract_strided_slice %147 {offsets = [0, 32], sizes = [8, 32], strides = [1, 1]} : vector<8x128xf32> to vector<8x32xf32>
    %151 = vector.extract_strided_slice %148 {offsets = [0, 64], sizes = [8, 32], strides = [1, 1]} : vector<8x128xf32> to vector<8x32xf32>
    %152 = vector.extract_strided_slice %147 {offsets = [0, 96], sizes = [8, 32], strides = [1, 1]} : vector<8x128xf32> to vector<8x32xf32>
    %153 = arith.mulf %150, %134 : vector<8x32xf32>
    %154 = arith.mulf %149, %151 : vector<8x32xf32>
    %155 = arith.addf %153, %154 : vector<8x32xf32>
    %156 = math.tanh %155 : vector<8x32xf32>
    %157 = arith.mulf %152, %156 : vector<8x32xf32>
    %c7 = arith.constant 7 : index
    %c0_47 = arith.constant 0 : index
    %158 = tpu.strided_load %arg9[%c7, %c0_47] {strides = array<i32: 8, 1>} : memref<64x128xf32, #tpu.memory_space<vmem>>, vector<8x128xf32>
    %159 = arith.truncf %157 : vector<8x32xf32> to vector<8x32xbf16>
    %cst_48 = arith.constant dense<0.000000e+00> : vector<8x128xf32>
    %160 = tpu.matmul %159, %0, %cst_48 {dimension_numbers = #tpu.dot_dimension_numbers<[1], [0], [0], [1], [0, 0, 1, 1], [], []>} : vector<8x32xbf16>, vector<32x128xbf16>, vector<8x128xf32> -> vector<8x128xf32>
    %161 = arith.addf %158, %160 : vector<8x128xf32>
    %cst_49 = arith.constant 5.000000e-01 : f32
    %162 = vector.broadcast %cst_49 : f32 to vector<8x128xf32>
    %163 = arith.mulf %162, %161 : vector<8x128xf32>
    %164 = math.tanh %163 : vector<8x128xf32>
    %cst_50 = arith.constant 5.000000e-01 : f32
    %165 = vector.broadcast %cst_50 : f32 to vector<8x128xf32>
    %166 = arith.mulf %165, %164 : vector<8x128xf32>
    %cst_51 = arith.constant 5.000000e-01 : f32
    %167 = vector.broadcast %cst_51 : f32 to vector<8x128xf32>
    %168 = arith.addf %166, %167 : vector<8x128xf32>
    %169 = math.tanh %161 : vector<8x128xf32>
    %170 = vector.extract_strided_slice %168 {offsets = [0, 0], sizes = [8, 32], strides = [1, 1]} : vector<8x128xf32> to vector<8x32xf32>
    %171 = vector.extract_strided_slice %168 {offsets = [0, 32], sizes = [8, 32], strides = [1, 1]} : vector<8x128xf32> to vector<8x32xf32>
    %172 = vector.extract_strided_slice %169 {offsets = [0, 64], sizes = [8, 32], strides = [1, 1]} : vector<8x128xf32> to vector<8x32xf32>
    %173 = vector.extract_strided_slice %168 {offsets = [0, 96], sizes = [8, 32], strides = [1, 1]} : vector<8x128xf32> to vector<8x32xf32>
    %174 = arith.mulf %171, %155 : vector<8x32xf32>
    %175 = arith.mulf %170, %172 : vector<8x32xf32>
    %176 = arith.addf %174, %175 : vector<8x32xf32>
    %177 = math.tanh %176 : vector<8x32xf32>
    %178 = arith.mulf %173, %177 : vector<8x32xf32>
    %179 = arith.truncf %178 : vector<8x32xf32> to vector<8x32xbf16>
    %c0_52 = arith.constant 0 : index
    %c0_53 = arith.constant 0 : index
    %180 = vector.load %arg4[%c0_52, %c0_53] : memref<32x64xbf16, #tpu.memory_space<vmem>>, vector<32x64xbf16>
    %cst_54 = arith.constant dense<0.000000e+00> : vector<8x64xf32>
    %181 = tpu.matmul %179, %180, %cst_54 {dimension_numbers = #tpu.dot_dimension_numbers<[1], [0], [0], [1], [0, 0, 1, 1], [], []>} : vector<8x32xbf16>, vector<32x64xbf16>, vector<8x64xf32> -> vector<8x64xf32>
    %c0_55 = arith.constant 0 : index
    %c0_56 = arith.constant 0 : index
    %182 = vector.load %arg5[%c0_55, %c0_56] : memref<1x64xf32, #tpu.memory_space<vmem>>, vector<1x64xf32>
    %183 = vector.broadcast %182 : vector<1x64xf32> to vector<8x64xf32>
    %184 = arith.addf %181, %183 : vector<8x64xf32>
    %cst_57 = arith.constant 0.000000e+00 : f32
    %185 = vector.broadcast %cst_57 : f32 to vector<8x64xf32>
    %186 = arith.maximumf %184, %185 : vector<8x64xf32>
    %c0_58 = arith.constant 0 : index
    %c0_59 = arith.constant 0 : index
    %187 = vector.load %arg6[%c0_58, %c0_59] : memref<1x64xf32, #tpu.memory_space<vmem>>, vector<1x64xf32>
    %188 = vector.broadcast %187 : vector<1x64xf32> to vector<8x64xf32>
    %189 = arith.mulf %186, %188 : vector<8x64xf32>
    %cst_60 = arith.constant dense<0.000000e+00> : vector<8xf32>
    %190 = vector.multi_reduction <add>, %189, %cst_60 [1] : vector<8x64xf32> to vector<8xf32>
    %191 = vector.shape_cast %190 : vector<8xf32> to vector<8x1xf32>
    %c0_61 = arith.constant 0 : index
    %c0_62 = arith.constant 0 : index
    %192 = vector.load %arg7[%c0_61, %c0_62] : memref<1x1xf32, #tpu.memory_space<vmem>>, vector<1x1xf32>
    %193 = vector.broadcast %192 : vector<1x1xf32> to vector<8x1xf32>
    %194 = arith.addf %191, %193 : vector<8x1xf32>
    %c0_63 = arith.constant 0 : index
    %c0_64 = arith.constant 0 : index
    %195 = vector.load %arg8[%c0_63, %c0_64] : memref<8x1xf32, #tpu.memory_space<vmem>>, vector<8x1xf32>
    tpu.vector_store %arg8[%c0_63, %c0_64], %194 {strides = array<i32>} : memref<8x1xf32, #tpu.memory_space<vmem>>, vector<8x1xf32>,
    return
  }
}

</mosaic_0001>

<bundles_post_ra>
// kernel: lstm_model_forward.1
= control target key start
LH: loop header
LB: loop body
LE: loop exit
PB: predicated region body
PF: predicated region fallthrough
CT: control target
= control target key end

     0   :  { %s1371_s0 = inlined_call_operand.hbm [shape: f32[64,16], index: 0, kind: input, shape index: {}]   ;;  %s1372_s1 = inlined_call_operand.vmem [shape: bf16[16,128], index: 1, kind: input, shape index: {}]   ;;  %s1373_s2 = inlined_call_operand.vmem [shape: bf16[32,128], index: 2, kind: input, shape index: {}]   ;;  %s1374_s3 = inlined_call_operand.vmem [shape: f32[1,128], index: 3, kind: input, shape index: {}]   ;;  %s1375_s4 = inlined_call_operand.hbm [shape: bf16[32,64], index: 4, kind: input, shape index: {}]   ;;  %s1376_s5 = inlined_call_operand.vmem [shape: f32[1,64], index: 5, kind: input, shape index: {}]   ;;  %s1377_s6 = inlined_call_operand.hbm [shape: f32[1,64], index: 6, kind: input, shape index: {}]   ;;  %s1378_s7 = inlined_call_operand.<no memory space> [shape: f32[1,1], index: 7, kind: input, shape index: {}]   ;;  %s1379_s8 = inlined_call_operand.vmem [shape: f32[8,1], index: 8, kind: output, shape index: {}]  }
   0x1   :  { %v13_v0 = vstv %s1378_s7 }
   0x2   :  { %14 = vst [vmem:[#allocation3] sm:$0x1] %v13_v0 }
   0x3   :  { %15 = vsyncpa [#allocation5], 0 }
   0x4   :  { %16 = vsyncpa [#allocation7], 0  ;;  %s1156_s29 = smov [#allocation6]   ;;  %s1086_s11 = scalar_lea.hbm %s1375_s4, 256 }
   0x5   :  { %s40_s30 = sshll.u32 %s1156_s29, 4  ;;  %p1087_p0 = scmp.ne.s32.totalorder %s1375_s4, %s1086_s11  ;;  %s41_s30 = int_to_ptr.vmem [resolvable:$true] %s40_s30 }
   0x6   :  { %p1090_p1 = scmp.lt.u32.totalorder %s1086_s11, %s1375_s4 }
   0x8   :  { %p1092_p2 = pnand %p1090_p1, %p1087_p0 }
   0xa   :  { %1095 = shalt.err (!%p1092_p2)
}
   0xb   :  { %s1096_s7 = scalar_lea.vmem %s41_s30, 256  ;;  %p1101_p4 = scmp.lt.s32.totalorder %s41_s30, %s41_s30 }
   0xc   :  { %p1097_p3 = scmp.ne.s32.totalorder %s41_s30, %s1096_s7  ;;  %p1102_p5 = scmp.lt.s32.totalorder %s1096_s7, %s1096_s7 }
   0xe   :  { %p1103_p6 = por %p1102_p5, %p1101_p4 }
  0x10   :  { %p1104_p7 = pnand %p1103_p6, %p1097_p3 }
  0x12   :  { %1107 = shalt.err (!%p1104_p7)
}
  0x13   :  { %s1157_s16 = smov 64   ;;  %s1158_s17 = smov 4  }
  0x14   :  { %46 = dma.hbm_to_vmem [thread:$0]  %s1375_s4, 256, %s41_s30, [#allocation7], %s1157_s16, %s1157_s16, %s1158_s17  }
  0x15   :  { %s1159_s20 = smov [#allocation4]   ;;  %s1108_s24 = scalar_lea.hbm %s1371_s0, 1024 }
  0x16   :  { %s22_s21 = sshll.u32 %s1159_s20, 4  ;;  %p1109_p8 = scmp.ne.s32.totalorder %s1371_s0, %s1108_s24  ;;  %s23_s21 = int_to_ptr.vmem [resolvable:$true] %s22_s21 }
  0x17   :  { %p1112_p9 = scmp.lt.u32.totalorder %s1108_s24, %s1371_s0 }
  0x19   :  { %p1114_p10 = pnand %p1112_p9, %p1109_p8 }
  0x1b   :  { %1117 = shalt.err (!%p1114_p10)
}
  0x1c   :  { %s1118_s29 = scalar_lea.vmem %s23_s21, 1024  ;;  %p1123_p12 = scmp.lt.s32.totalorder %s23_s21, %s23_s21 }
  0x1d   :  { %p1119_p11 = scmp.ne.s32.totalorder %s23_s21, %s1118_s29  ;;  %p1124_p13 = scmp.lt.s32.totalorder %s1118_s29, %s1118_s29 }
  0x1f   :  { %p1125_p0 = por %p1124_p13, %p1123_p12 }
  0x21   :  { %p1126_p1 = pnand %p1125_p0, %p1119_p11 }
  0x23   :  { %1129 = shalt.err (!%p1126_p1)
}
  0x24   :  { %s1160_s4 = smov 128   ;;  %s1161_s30 = smov 8  }
  0x25   :  { %28 = dma.hbm_to_vmem [thread:$0]  %s1371_s0, 1024, %s23_s21, [#allocation5], %s1160_s4, %s1160_s4, %s1161_s30  }
  0x26   :  { %s1162_s11 = smov [#allocation8]   ;;  %s1130_s15 = scalar_lea.hbm %s1377_s6, 16 }
  0x27   :  { %s55_s12 = sshll.u32 %s1162_s11, 4  ;;  %p1131_p2 = scmp.ne.s32.totalorder %s1377_s6, %s1130_s15  ;;  %s56_s12 = int_to_ptr.vmem [resolvable:$true] %s55_s12 }
  0x28   :  { %p1134_p3 = scmp.lt.u32.totalorder %s1130_s15, %s1377_s6 }
  0x2a   :  { %p1136_p4 = pnand %p1134_p3, %p1131_p2 }
  0x2c   :  { %1139 = shalt.err (!%p1136_p4)
}
  0x2d   :  { %s1140_s20 = scalar_lea.vmem %s56_s12, 16  ;;  %s1144_s0 = scalar_lea.vmem %s56_s12, 32 }
  0x2e   :  { %p1141_p5 = scmp.ne.s32.totalorder %s56_s12, %s1140_s20  ;;  %p1145_p6 = scmp.lt.s32.totalorder %s56_s12, %s56_s12 }
  0x2f   :  { %p1146_p7 = scmp.lt.s32.totalorder %s1144_s0, %s1140_s20 }
  0x31   :  { %p1147_p8 = por %p1146_p7, %p1145_p6 }
  0x33   :  { %p1148_p9 = pnand %p1147_p8, %p1141_p5 }
  0x35   :  { %1151 = shalt.err (!%p1148_p9)
}
  0x36   :  { %58 = dma.hbm_to_vmem [thread:$0]  %s1377_s6, 16, %s56_s12, [#allocation7]  }
  0x37   :  { %1152 = dma.done.wait [#allocation5], 1024  }
  0x38   :  { %1153 = vsyncadd [#allocation5], 4294966272 }
  0x39   :  { %1154 = dma.done.wait [#allocation7], 272  }
  0x3a   :  { %1155 = vsyncadd [#allocation7], 4294967024  ;;  %v1163_v1 = vmov 0.0   ;;  %vm1164_vm0 = vmmov 0   ;;  %v1033_v2 = vld [vmem:[%s1372_s1] sm:$0xff]   ;;  %v76_v4 = vld [vmem:[#allocation4 + $0x8] sm:$0xff] }
  0x3b   :  { %950 = vmatprep.subr.bf16.mxu1 %v1163_v1  ;;  %954 = vmatprep.mubr.msk.bf16.mxu1 %vm1164_vm0, %v1163_v1  ;;  %v75_v3 = vld [vmem:[#allocation4] sm:$0xff]  ;;  %vm102_vm1 = vcmask 130048   ;;  %v77_v5 = vld [vmem:[#allocation4 + $0x10] sm:$0xff]  ;;  %v78_v7 = vld [vmem:[#allocation4 + $0x18] sm:$0xff]  ;;  %v1165_v17 = vmov 0   ;;  %vm203_vm2 = vcmask 261120  }
  0x3c   :  { %940 = vmatprep.subr.bf16.mxu0 %v1033_v2  ;;  %v83_v6 = vpack.c.bf16 %v76_v4, %v75_v3  ;;  %v79_v8 = vld [vmem:[#allocation4 + $0x20] sm:$0xff]  ;;  %v80_v9 = vld [vmem:[#allocation4 + $0x28] sm:$0xff]  ;;  %v84_v10 = vpack.c.bf16 %v78_v7, %v77_v5  ;;  %v81_v14 = vld [vmem:[#allocation4 + $0x30] sm:$0xff]  ;;  %vm867_vm3 = vcmask 523264   ;;  %vm879_vm4 = vcmask 7168  }
  0x3d   :  { %941 = vmatpush3.bf16.msra.mxu0 %v1033_v2  ;;  %v85_v11 = vpack.c.bf16 %v80_v9, %v79_v8  ;;  %v1263_v12 = vld [vmem:[%s1373_s2] sm:$0xff]   ;;  %v1269_v13 = vld [vmem:[%s1373_s2 + $0x8] sm:$0xff]  }
  0x3e   :  { %942 = vmatprep.mubr.msk.bf16.mxu0 %vm102_vm1, %v83_v6  ;;  %966 = vmatprep.subr.bf16.mxu0 %v1163_v1  ;;  %v82_v15 = vld [vmem:[#allocation4 + $0x38] sm:$0xff] }
  0x3f   :  { %951 = vmatpush3.bf16.msra.mxu1 %v1263_v12  ;;  %v86_v16 = vpack.c.bf16 %v82_v15, %v81_v14  ;;  %v887_v18 = vld [vmem:[%s1374_s3] ss:$0 sm:$0xff]  ;;  %s1166_s3 = smov 32  }
  0x40   :  { %943 = vmatmul.mubr.msk.bf16.vlgmr.msra.gmra.mrb[0].mxu0 %vm102_vm1, %v84_v10  ;;  %952 = vmatprep.subr.bf16.mxu1 %v1163_v1 }
  0x41   :  { %946 = vmatprep.mubr.msk.bf16.mxu0 %vm102_vm1, %v85_v11  ;;  %967 = vmatpush3.bf16.msra.mxu0 %v1263_v12 }
  0x42   :  { %968 = vmatprep.subr.bf16.mxu0 %v1163_v1 }
  0x43   :  { %953 = vmatpush3.bf16.msra.mxu1 %v1269_v13 }
  0x44   :  { %958 = vmatprep.subr.bf16.mxu1 %v1163_v1 }
  0x45   :  { %969 = vmatpush3.bf16.msra.mxu0 %v1269_v13 }
  0x46   :  { %955 = vmatmul.mubr.bf16.vlgmr.msra.gmra.mrb[0].mxu1 %v1165_v17  ;;  %982 = vmatprep.subr.bf16.mxu0 %v1163_v1 }
  0x47   :  { %959 = vmatpush3.bf16.msra.mxu1 %v1263_v12  ;;  %962 = vmatprep.mubr.msk.bf16.mxu1 %vm1164_vm0, %v1163_v1 }
  0x48   :  { %947 = vmatmul.mubr.msk.bf16.gmra.mrb[4].mxu0 %vm102_vm1, %v86_v16  ;;  %960 = vmatprep.subr.bf16.mxu1 %v1163_v1 }
  0x49   :  { %970 = vmatprep.mubr.msk.bf16.mxu0 %vm1164_vm0, %v1163_v1 }
  0x4b   :  { %961 = vmatpush3.bf16.msra.mxu1 %v1269_v13 }
  0x4c   :  { %974 = vmatprep.subr.bf16.mxu1 %v1163_v1 }
 0x113   :  { %v944_v19 = vpop.f32.mrb[0].mxu0 }
 0x114   :  { %v158_v20 = vadd.f32 %v944_v19, %v887_v18  ;;  %v149_v21 = vpop.f32.mrb[1].mxu0 }
 0x115   :  { %v150_v22 = vadd.f32 %v887_v18, %v149_v21  ;;  %v945_v23 = vpop.f32.mrb[2].mxu0 }
 0x116   :  { %182 = vst [vmem:[#allocation2 + $0x10] sm:$0xff] %v158_v20  ;;  %v161_v24 = vadd.f32 %v945_v23, %v887_v18  ;;  %v152_v25 = vpop.f32.mrb[3].mxu0 }
 0x117   :  { %180 = vst [vmem:[#allocation2] sm:$0xff] %v150_v22  ;;  %v153_v26 = vadd.f32 %v887_v18, %v152_v25 }
 0x118   :  { %183 = vst [vmem:[#allocation2 + $0x18] sm:$0xff] %v161_v24 }
 0x119   :  { %181 = vst [vmem:[#allocation2 + $0x8] sm:$0xff] %v153_v26  ;;  %v241_v27 = vpop.f32.mrb[0].mxu1 }
 0x11a   :  { %v956_v29 = vpop.f32.mrb[1].mxu1 }
 0x11b   :  { %v948_v28 = vpop.f32.mrb[4].mxu0  ;;  %v244_v32 = vpop.f32.mrb[2].mxu1 }
 0x11c   :  { %v174_v30 = vadd.f32 %v948_v28, %v887_v18  ;;  %v165_v31 = vpop.f32.mrb[5].mxu0  ;;  %v957_v35 = vpop.f32.mrb[3].mxu1 }
 0x11d   :  { %v166_v33 = vadd.f32 %v887_v18, %v165_v31  ;;  %v949_v34 = vpop.f32.mrb[6].mxu0 }
 0x11e   :  { %186 = vst [vmem:[#allocation2 + $0x30] sm:$0xff] %v174_v30  ;;  %v177_v36 = vadd.f32 %v949_v34, %v887_v18  ;;  %v168_v37 = vpop.f32.mrb[7].mxu0 }
 0x11f   :  { %184 = vst [vmem:[#allocation2 + $0x20] sm:$0xff] %v166_v33  ;;  %v169_v38 = vadd.f32 %v887_v18, %v168_v37 }
 0x120   :  { %187 = vst [vmem:[#allocation2 + $0x38] sm:$0xff] %v177_v36  ;;  %v188_v39 = vld [vmem:[#allocation2] ss:$8 sm:$0xf] }
 0x121   :  { %185 = vst [vmem:[#allocation2 + $0x28] sm:$0xff] %v169_v38  ;;  %v271_v59 = vld [vmem:[#allocation2 + $0x1] ss:$8 sm:$0xf] }
 0x122   :  { %v345_v21 = vld [vmem:[#allocation2 + $0x2] ss:$8 sm:$0xf] }
 0x128   :  { %v189_v40 = vld [vmem:[#allocation2] ss:$8 sm:$0xf0]  ;;  %v272_v58 = vld [vmem:[#allocation2 + $0x1] ss:$8 sm:$0xf0] }
 0x129   :  { %v190_v41 = vor.u32 %v189_v40, %v188_v39  ;;  %v273_v60 = vor.u32 %v272_v58, %v271_v59  ;;  %v346_v20 = vld [vmem:[#allocation2 + $0x2] ss:$8 sm:$0xf0] }
 0x12a   :  { %v347_v22 = vor.u32 %v346_v20, %v345_v21 }
 0x12b   :  { %v247_v42 = vadd.f32 %v241_v27, %v190_v41 }
 0x12d   :  { %1038 = vtanh.f32 %v247_v42  ;;  %v248_v44 = vmul.f32 0.5, %v247_v42 }
 0x12f   :  { %1040 = vtanh.f32 %v248_v44  ;;  %v419_v44 = vld [vmem:[#allocation2 + $0x3] ss:$8 sm:$0xf] }
 0x137   :  { %v1039_v43 = vpop.eup %1038 }
 0x138   :  { %255 = vrot.lane.b32.xlu0 %v1039_v43, %s1157_s16  ;;  %v420_v43 = vld [vmem:[#allocation2 + $0x3] ss:$8 sm:$0xf0] }
 0x139   :  { %v1041_v45 = vpop.eup %1040 }
 0x13a   :  { %v250_v46 = vmul.f32 0.5, %v1041_v45  ;;  %v421_v45 = vor.u32 %v420_v43, %v419_v44 }
 0x13c   :  { %v251_v47 = vadd.f32 0.5, %v250_v46 }
 0x13e   :  { %v253_v50 = vmul.f32 0.0, %v251_v47 }
 0x1aa   :  { %v256_v48 = vpop.permute.xlu0 %255 }
 0x1ab   :  { %v258_v49 = vmul.f32 %v256_v48, %v251_v47 }
 0x1ad   :  { %260 = vrot.lane.b32.xlu0 %v258_v49, %s1166_s3 }
 0x21f   :  { %v261_v51 = vpop.permute.xlu0 %260 }
 0x220   :  { %v263_v52 = vadd.f32 %v261_v51, %v253_v50 }
 0x222   :  { %1042 = vtanh.f32 %v263_v52 }
 0x22c   :  { %v1043_v53 = vpop.eup %1042 }
 0x22d   :  { %266 = vrot.lane.b32.xlu1 %v1043_v53, %s1157_s16 }
 0x29f   :  { %v267_v54 = vpop.permute.xlu1 %266 }
 0x2a0   :  { %v269_v55 = vmul.f32 %v267_v54, %v251_v47 }
 0x2a2   :  { %v274_v56 = vpack.c.bf16 %v269_v55, %v269_v55 }
 0x2a4   :  { %276 = vrot.lane.b32.xlu1 %v274_v56, %s1166_s3 }
 0x316   :  { %v277_v57 = vpop.permute.xlu1 %276 }
 0x317   :  { %963 = vmatmul.mubr.msk.bf16.vlgmr.msra.gmra.mrb[4].mxu1 %vm203_vm2, %v277_v57 }
 0x318   :  { %975 = vmatpush3.bf16.msra.mxu1 %v1263_v12  ;;  %978 = vmatprep.mubr.msk.bf16.mxu1 %vm1164_vm0, %v1163_v1 }
 0x319   :  { %976 = vmatprep.subr.bf16.mxu1 %v1163_v1 }
 0x31c   :  { %977 = vmatpush3.bf16.msra.mxu1 %v1269_v13 }
 0x31d   :  { %990 = vmatprep.subr.bf16.mxu1 %v1163_v1 }
 0x3ea   :  { %v315_v61 = vpop.f32.mrb[4].mxu1 }
 0x3eb   :  { %v321_v62 = vadd.f32 %v315_v61, %v273_v60  ;;  %v964_v63 = vpop.f32.mrb[5].mxu1 }
 0x3ec   :  { %v318_v0 = vpop.f32.mrb[6].mxu1 }
 0x3ed   :  { %1044 = vtanh.f32 %v321_v62  ;;  %v965_v2 = vpop.f32.mrb[7].mxu1  ;;  %v322_v4 = vmul.f32 0.5, %v321_v62 }
 0x3ef   :  { %1046 = vtanh.f32 %v322_v4  ;;  %v493_v4 = vld [vmem:[#allocation2 + $0x4] ss:$8 sm:$0xf] }
 0x3f7   :  { %v1045_v3 = vpop.eup %1044 }
 0x3f8   :  { %329 = vrot.lane.b32.xlu0 %v1045_v3, %s1157_s16  ;;  %v494_v3 = vld [vmem:[#allocation2 + $0x4] ss:$8 sm:$0xf0] }
 0x3f9   :  { %v1047_v5 = vpop.eup %1046 }
 0x3fa   :  { %v324_v6 = vmul.f32 0.5, %v1047_v5  ;;  %v495_v5 = vor.u32 %v494_v3, %v493_v4 }
 0x3fc   :  { %v325_v7 = vadd.f32 0.5, %v324_v6 }
 0x3fe   :  { %v327_v10 = vmul.f32 %v325_v7, %v263_v52 }
 0x46a   :  { %v330_v8 = vpop.permute.xlu0 %329 }
 0x46b   :  { %v332_v9 = vmul.f32 %v330_v8, %v325_v7 }
 0x46d   :  { %334 = vrot.lane.b32.xlu1 %v332_v9, %s1166_s3 }
 0x4df   :  { %v335_v11 = vpop.permute.xlu1 %334 }
 0x4e0   :  { %v337_v14 = vadd.f32 %v335_v11, %v327_v10 }
 0x4e2   :  { %1048 = vtanh.f32 %v337_v14 }
 0x4ec   :  { %v1049_v15 = vpop.eup %1048 }
 0x4ed   :  { %340 = vrot.lane.b32.xlu0 %v1049_v15, %s1157_s16 }
 0x55f   :  { %v341_v16 = vpop.permute.xlu0 %340 }
 0x560   :  { %v343_v17 = vmul.f32 %v341_v16, %v325_v7 }
 0x562   :  { %v348_v18 = vpack.c.bf16 %v343_v17, %v343_v17 }
 0x564   :  { %350 = vrot.lane.b32.xlu1 %v348_v18, %s1166_s3 }
 0x5d6   :  { %v351_v19 = vpop.permute.xlu1 %350 }
 0x5d7   :  { %971 = vmatmul.mubr.msk.bf16.vlgmr.msra.gmra.mrb[8].mxu0 %vm203_vm2, %v351_v19 }
 0x5d8   :  { %983 = vmatpush3.bf16.msra.mxu0 %v1263_v12  ;;  %986 = vmatprep.mubr.msk.bf16.mxu0 %vm1164_vm0, %v1163_v1 }
 0x5d9   :  { %984 = vmatprep.subr.bf16.mxu0 %v1163_v1 }
 0x5dc   :  { %985 = vmatpush3.bf16.msra.mxu0 %v1269_v13 }
 0x5dd   :  { %998 = vmatprep.subr.bf16.mxu0 %v1163_v1 }
 0x6aa   :  { %v389_v23 = vpop.f32.mrb[8].mxu0 }
 0x6ab   :  { %v395_v24 = vadd.f32 %v389_v23, %v347_v22  ;;  %v972_v25 = vpop.f32.mrb[9].mxu0 }
 0x6ac   :  { %v392_v26 = vpop.f32.mrb[10].mxu0 }
 0x6ad   :  { %1050 = vtanh.f32 %v395_v24  ;;  %v973_v27 = vpop.f32.mrb[11].mxu0  ;;  %v396_v29 = vmul.f32 0.5, %v395_v24 }
 0x6af   :  { %1052 = vtanh.f32 %v396_v29  ;;  %v567_v29 = vld [vmem:[#allocation2 + $0x5] ss:$8 sm:$0xf] }
 0x6b7   :  { %v1051_v28 = vpop.eup %1050 }
 0x6b8   :  { %403 = vrot.lane.b32.xlu0 %v1051_v28, %s1157_s16  ;;  %v568_v28 = vld [vmem:[#allocation2 + $0x5] ss:$8 sm:$0xf0] }
 0x6b9   :  { %v1053_v30 = vpop.eup %1052 }
 0x6ba   :  { %v398_v31 = vmul.f32 0.5, %v1053_v30  ;;  %v569_v30 = vor.u32 %v568_v28, %v567_v29  ;;  %v1036_v29 = vld [vmem:[#allocation6] sm:$0xff]  }
 0x6bc   :  { %v399_v32 = vadd.f32 0.5, %v398_v31 }
 0x6be   :  { %v401_v35 = vmul.f32 %v399_v32, %v337_v14 }
 0x72a   :  { %v404_v33 = vpop.permute.xlu0 %403 }
 0x72b   :  { %v406_v34 = vmul.f32 %v404_v33, %v399_v32 }
 0x72d   :  { %408 = vrot.lane.b32.xlu1 %v406_v34, %s1166_s3 }
 0x79f   :  { %v409_v36 = vpop.permute.xlu1 %408 }
 0x7a0   :  { %v411_v37 = vadd.f32 %v409_v36, %v401_v35 }
 0x7a2   :  { %1054 = vtanh.f32 %v411_v37 }
 0x7ac   :  { %v1055_v38 = vpop.eup %1054 }
 0x7ad   :  { %414 = vrot.lane.b32.xlu0 %v1055_v38, %s1157_s16 }
 0x81f   :  { %v415_v39 = vpop.permute.xlu0 %414 }
 0x820   :  { %v417_v40 = vmul.f32 %v415_v39, %v399_v32 }
 0x822   :  { %v422_v41 = vpack.c.bf16 %v417_v40, %v417_v40 }
 0x824   :  { %424 = vrot.lane.b32.xlu1 %v422_v41, %s1166_s3 }
 0x896   :  { %v425_v42 = vpop.permute.xlu1 %424 }
 0x897   :  { %979 = vmatmul.mubr.msk.bf16.vlgmr.msra.gmra.mrb[8].mxu1 %vm203_vm2, %v425_v42 }
 0x898   :  { %991 = vmatpush3.bf16.msra.mxu1 %v1263_v12  ;;  %994 = vmatprep.mubr.msk.bf16.mxu1 %vm1164_vm0, %v1163_v1 }
 0x899   :  { %992 = vmatprep.subr.bf16.mxu1 %v1163_v1 }
 0x89c   :  { %993 = vmatpush3.bf16.msra.mxu1 %v1269_v13 }
 0x89d   :  { %1006 = vmatprep.subr.bf16.mxu1 %v1163_v1 }
 0x96a   :  { %v463_v46 = vpop.f32.mrb[8].mxu1 }
 0x96b   :  { %v469_v47 = vadd.f32 %v463_v46, %v421_v45  ;;  %v980_v48 = vpop.f32.mrb[9].mxu1 }
 0x96c   :  { %v466_v49 = vpop.f32.mrb[10].mxu1 }
 0x96d   :  { %1056 = vtanh.f32 %v469_v47  ;;  %v981_v50 = vpop.f32.mrb[11].mxu1  ;;  %v470_v52 = vmul.f32 0.5, %v469_v47  ;;  %v642_v49 = vld [vmem:[#allocation2 + $0x6] ss:$8 sm:$0xf0] }
 0x96e   :  { %v641_v50 = vld [vmem:[#allocation2 + $0x6] ss:$8 sm:$0xf] }
 0x96f   :  { %1058 = vtanh.f32 %v470_v52 }
 0x977   :  { %v1057_v51 = vpop.eup %1056 }
 0x978   :  { %477 = vrot.lane.b32.xlu0 %v1057_v51, %s1157_s16  ;;  %v643_v51 = vor.u32 %v642_v49, %v641_v50 }
 0x979   :  { %v1059_v53 = vpop.eup %1058 }
 0x97a   :  { %v472_v54 = vmul.f32 0.5, %v1059_v53 }
 0x97c   :  { %v473_v55 = vadd.f32 0.5, %v472_v54 }
 0x97e   :  { %v475_v58 = vmul.f32 %v473_v55, %v411_v37 }
 0x9ea   :  { %v478_v56 = vpop.permute.xlu0 %477 }
 0x9eb   :  { %v480_v57 = vmul.f32 %v478_v56, %v473_v55 }
 0x9ed   :  { %482 = vrot.lane.b32.xlu1 %v480_v57, %s1166_s3 }
 0xa5f   :  { %v483_v59 = vpop.permute.xlu1 %482 }
 0xa60   :  { %v485_v60 = vadd.f32 %v483_v59, %v475_v58 }
 0xa62   :  { %1060 = vtanh.f32 %v485_v60 }
 0xa6c   :  { %v1061_v61 = vpop.eup %1060 }
 0xa6d   :  { %488 = vrot.lane.b32.xlu0 %v1061_v61, %s1157_s16 }
 0xadf   :  { %v489_v62 = vpop.permute.xlu0 %488 }
 0xae0   :  { %v491_v63 = vmul.f32 %v489_v62, %v473_v55 }
 0xae2   :  { %v496_v0 = vpack.c.bf16 %v491_v63, %v491_v63 }
 0xae4   :  { %498 = vrot.lane.b32.xlu1 %v496_v0, %s1166_s3 }
 0xb56   :  { %v499_v2 = vpop.permute.xlu1 %498 }
 0xb57   :  { %987 = vmatmul.mubr.msk.bf16.vlgmr.msra.gmra.mrb[12].mxu0 %vm203_vm2, %v499_v2 }
 0xb58   :  { %999 = vmatpush3.bf16.msra.mxu0 %v1263_v12  ;;  %1002 = vmatprep.mubr.msk.bf16.mxu0 %vm1164_vm0, %v1163_v1 }
 0xb59   :  { %1000 = vmatprep.subr.bf16.mxu0 %v1163_v1 }
 0xb5c   :  { %1001 = vmatpush3.bf16.msra.mxu0 %v1269_v13 }
 0xb5d   :  { %1014 = vmatprep.subr.bf16.mxu0 %v1163_v1 }
 0xc2a   :  { %v537_v6 = vpop.f32.mrb[12].mxu0 }
 0xc2b   :  { %v543_v7 = vadd.f32 %v537_v6, %v495_v5  ;;  %v988_v8 = vpop.f32.mrb[13].mxu0 }
 0xc2c   :  { %v540_v9 = vpop.f32.mrb[14].mxu0 }
 0xc2d   :  { %1062 = vtanh.f32 %v543_v7  ;;  %v989_v10 = vpop.f32.mrb[15].mxu0  ;;  %v544_v14 = vmul.f32 0.5, %v543_v7  ;;  %v716_v9 = vld [vmem:[#allocation2 + $0x7] ss:$8 sm:$0xf0] }
 0xc2e   :  { %v715_v10 = vld [vmem:[#allocation2 + $0x7] ss:$8 sm:$0xf] }
 0xc2f   :  { %1064 = vtanh.f32 %v544_v14 }
 0xc37   :  { %v1063_v11 = vpop.eup %1062 }
 0xc38   :  { %551 = vrot.lane.b32.xlu0 %v1063_v11, %s1157_s16  ;;  %v717_v11 = vor.u32 %v716_v9, %v715_v10 }
 0xc39   :  { %v1065_v15 = vpop.eup %1064 }
 0xc3a   :  { %v546_v16 = vmul.f32 0.5, %v1065_v15 }
 0xc3c   :  { %v547_v17 = vadd.f32 0.5, %v546_v16 }
 0xc3e   :  { %v549_v20 = vmul.f32 %v547_v17, %v485_v60 }
 0xcaa   :  { %v552_v18 = vpop.permute.xlu0 %551 }
 0xcab   :  { %v554_v19 = vmul.f32 %v552_v18, %v547_v17 }
 0xcad   :  { %556 = vrot.lane.b32.xlu1 %v554_v19, %s1166_s3 }
 0xd1f   :  { %v557_v21 = vpop.permute.xlu1 %556 }
 0xd20   :  { %v559_v22 = vadd.f32 %v557_v21, %v549_v20 }
 0xd22   :  { %1066 = vtanh.f32 %v559_v22 }
 0xd2c   :  { %v1067_v23 = vpop.eup %1066 }
 0xd2d   :  { %562 = vrot.lane.b32.xlu0 %v1067_v23, %s1157_s16 }
 0xd9f   :  { %v563_v24 = vpop.permute.xlu0 %562 }
 0xda0   :  { %v565_v25 = vmul.f32 %v563_v24, %v547_v17 }
 0xda2   :  { %v570_v26 = vpack.c.bf16 %v565_v25, %v565_v25 }
 0xda4   :  { %572 = vrot.lane.b32.xlu1 %v570_v26, %s1166_s3 }
 0xe16   :  { %v573_v27 = vpop.permute.xlu1 %572 }
 0xe17   :  { %995 = vmatmul.mubr.msk.bf16.vlgmr.msra.gmra.mrb[12].mxu1 %vm203_vm2, %v573_v27 }
 0xe18   :  { %1007 = vmatpush3.bf16.msra.mxu1 %v1263_v12  ;;  %1010 = vmatprep.mubr.msk.bf16.mxu1 %vm1164_vm0, %v1163_v1 }
 0xe19   :  { %1008 = vmatprep.subr.bf16.mxu1 %v1163_v1 }
 0xe1c   :  { %1009 = vmatpush3.bf16.msra.mxu1 %v1269_v13 }
 0xeea   :  { %v611_v31 = vpop.f32.mrb[12].mxu1 }
 0xeeb   :  { %v617_v32 = vadd.f32 %v611_v31, %v569_v30  ;;  %v996_v33 = vpop.f32.mrb[13].mxu1  ;;  %v1037_v30 = vld [vmem:[#allocation6 + $0x8] sm:$0xff]  }
 0xeec   :  { %v614_v34 = vpop.f32.mrb[14].mxu1 }
 0xeed   :  { %1068 = vtanh.f32 %v617_v32  ;;  %v997_v35 = vpop.f32.mrb[15].mxu1  ;;  %v618_v12 = vmul.f32 0.5, %v617_v32 }
 0xeef   :  { %1070 = vtanh.f32 %v618_v12 }
 0xef7   :  { %v1069_v36 = vpop.eup %1068 }
 0xef8   :  { %625 = vrot.lane.b32.xlu0 %v1069_v36, %s1157_s16  ;;  %v902_v36 = vld [vmem:[%s1376_s5] ss:$0 sm:$0xff] }
 0xef9   :  { %v1071_v37 = vpop.eup %1070 }
 0xefa   :  { %v620_v38 = vmul.f32 0.5, %v1071_v37 }
 0xefc   :  { %v621_v39 = vadd.f32 0.5, %v620_v38 }
 0xefe   :  { %v623_v13 = vmul.f32 %v621_v39, %v559_v22 }
 0xf6a   :  { %v626_v40 = vpop.permute.xlu0 %625 }
 0xf6b   :  { %v628_v41 = vmul.f32 %v626_v40, %v621_v39 }
 0xf6d   :  { %630 = vrot.lane.b32.xlu1 %v628_v41, %s1166_s3 }
 0xfdf   :  { %v631_v42 = vpop.permute.xlu1 %630 }
 0xfe0   :  { %v633_v43 = vadd.f32 %v631_v42, %v623_v13 }
 0xfe2   :  { %1072 = vtanh.f32 %v633_v43 }
 0xfec   :  { %v1073_v44 = vpop.eup %1072 }
 0xfed   :  { %636 = vrot.lane.b32.xlu0 %v1073_v44, %s1157_s16 }
0x105f   :  { %v637_v45 = vpop.permute.xlu0 %636 }
0x1060   :  { %v639_v46 = vmul.f32 %v637_v45, %v621_v39  ;;  %v906_v39 = vld [vmem:[#allocation8] ss:$0 sm:$0xff] }
0x1062   :  { %v644_v47 = vpack.c.bf16 %v639_v46, %v639_v46 }
0x1064   :  { %646 = vrot.lane.b32.xlu1 %v644_v47, %s1166_s3 }
0x10d6   :  { %v647_v48 = vpop.permute.xlu1 %646 }
0x10d7   :  { %1003 = vmatmul.mubr.msk.bf16.vlgmr.msra.gmra.mrb[16].mxu0 %vm203_vm2, %v647_v48 }
0x10d8   :  { %1018 = vmatprep.mubr.msk.bf16.mxu0 %vm1164_vm0, %v1163_v1  ;;  %1015 = vmatpush3.bf16.msra.mxu0 %v1036_v29 }
0x10d9   :  { %1016 = vmatprep.subr.bf16.mxu0 %v1163_v1 }
0x10dc   :  { %1017 = vmatpush3.bf16.msra.mxu0 %v1037_v30 }
0x11aa   :  { %v685_v52 = vpop.f32.mrb[16].mxu0 }
0x11ab   :  { %v691_v53 = vadd.f32 %v685_v52, %v643_v51  ;;  %v1004_v54 = vpop.f32.mrb[17].mxu0 }
0x11ac   :  { %v688_v55 = vpop.f32.mrb[18].mxu0 }
0x11ad   :  { %1074 = vtanh.f32 %v691_v53  ;;  %v1005_v56 = vpop.f32.mrb[19].mxu0  ;;  %v692_v58 = vmul.f32 0.5, %v691_v53 }
0x11af   :  { %1076 = vtanh.f32 %v692_v58 }
0x11b7   :  { %v1075_v57 = vpop.eup %1074 }
0x11b8   :  { %699 = vrot.lane.b32.xlu0 %v1075_v57, %s1157_s16 }
0x11b9   :  { %v1077_v59 = vpop.eup %1076 }
0x11ba   :  { %v694_v60 = vmul.f32 0.5, %v1077_v59 }
0x11bc   :  { %v695_v61 = vadd.f32 0.5, %v694_v60 }
0x11be   :  { %v697_v0 = vmul.f32 %v695_v61, %v633_v43  ;;  %v907_v43 = vld [vmem:[#allocation3] ss:$0 sm:$0xff] }
0x122a   :  { %v700_v62 = vpop.permute.xlu0 %699 }
0x122b   :  { %v702_v63 = vmul.f32 %v700_v62, %v695_v61 }
0x122d   :  { %704 = vrot.lane.b32.xlu1 %v702_v63, %s1166_s3 }
0x129f   :  { %v705_v2 = vpop.permute.xlu1 %704 }
0x12a0   :  { %v707_v3 = vadd.f32 %v705_v2, %v697_v0 }
0x12a2   :  { %1078 = vtanh.f32 %v707_v3 }
0x12ac   :  { %v1079_v4 = vpop.eup %1078 }
0x12ad   :  { %710 = vrot.lane.b32.xlu0 %v1079_v4, %s1157_s16 }
0x131f   :  { %v711_v5 = vpop.permute.xlu0 %710 }
0x1320   :  { %v713_v6 = vmul.f32 %v711_v5, %v695_v61 }
0x1322   :  { %v718_v7 = vpack.c.bf16 %v713_v6, %v713_v6 }
0x1324   :  { %720 = vrot.lane.b32.xlu1 %v718_v7, %s1166_s3 }
0x1396   :  { %v721_v8 = vpop.permute.xlu1 %720 }
0x1397   :  { %1011 = vmatmul.mubr.msk.bf16.vlgmr.msra.gmra.mrb[16].mxu1 %vm203_vm2, %v721_v8 }
0x146a   :  { %v759_v14 = vpop.f32.mrb[16].mxu1 }
0x146b   :  { %v765_v15 = vadd.f32 %v759_v14, %v717_v11  ;;  %v1012_v16 = vpop.f32.mrb[17].mxu1 }
0x146c   :  { %v762_v17 = vpop.f32.mrb[18].mxu1 }
0x146d   :  { %1080 = vtanh.f32 %v765_v15  ;;  %v1013_v18 = vpop.f32.mrb[19].mxu1  ;;  %v766_v20 = vmul.f32 0.5, %v765_v15 }
0x146f   :  { %1082 = vtanh.f32 %v766_v20 }
0x1477   :  { %v1081_v19 = vpop.eup %1080 }
0x1478   :  { %773 = vrot.lane.b32.xlu0 %v1081_v19, %s1157_s16 }
0x1479   :  { %v1083_v21 = vpop.eup %1082 }
0x147a   :  { %v768_v22 = vmul.f32 0.5, %v1083_v21 }
0x147c   :  { %v769_v23 = vadd.f32 0.5, %v768_v22 }
0x147e   :  { %v771_v26 = vmul.f32 %v769_v23, %v707_v3 }
0x14ea   :  { %v774_v24 = vpop.permute.xlu0 %773 }
0x14eb   :  { %v776_v25 = vmul.f32 %v774_v24, %v769_v23 }
0x14ed   :  { %778 = vrot.lane.b32.xlu1 %v776_v25, %s1166_s3 }
0x155f   :  { %v779_v27 = vpop.permute.xlu1 %778 }
0x1560   :  { %v781_v28 = vadd.f32 %v779_v27, %v771_v26 }
0x1562   :  { %1084 = vtanh.f32 %v781_v28 }
0x156c   :  { %v1085_v31 = vpop.eup %1084 }
0x156d   :  { %784 = vrot.lane.b32.xlu0 %v1085_v31, %s1157_s16 }
0x15df   :  { %v785_v32 = vpop.permute.xlu0 %784 }
0x15e0   :  { %v787_v33 = vmul.f32 %v785_v32, %v769_v23 }
0x15e2   :  { %v788_v34 = vpack.c.bf16 %v787_v33, %v787_v33 }
0x15e4   :  { %801 = vrot.lane.b32.xlu1 %v788_v34, %s1166_s3 }
0x1656   :  { %v802_v35 = vpop.permute.xlu1 %801 }
0x1657   :  { %1019 = vmatmul.mubr.msk.bf16.vlgmr.msra.gmra.mrb[20].mxu0 %vm203_vm2, %v802_v35 }
0x172a   :  { %v852_v12 = vpop.f32.mrb[20].mxu0 }
0x172b   :  { %v853_v37 = vadd.f32 %v902_v36, %v852_v12  ;;  %v1020_v38 = vpop.f32.mrb[21].mxu0 }
0x172c   :  { %v855_v1 = vpop.f32.mrb[22].mxu0 }
0x172d   :  { %v858_v40 = vmax.f32 %v853_v37, 0.0  ;;  %v1021_v41 = vpop.f32.mrb[23].mxu0 }
0x172f   :  { %v866_v13 = vmul.f32 %v906_v39, %v858_v40 }
0x1731   :  { %v868_v42 = vsel %vm867_vm3, %v866_v13, 0.0 }
0x1732   :  { %869 = vadd.xlane.f32.xlu0 %v868_v42 }
0x17bf   :  { %v870_v44 = vpop.xlane.xlu0 %869 }
0x17c0   :  { %v878_v45 = vadd.f32 %v907_v43, %v870_v44 }
0x17c2   :  { %880 = vst.msk [vmem:[%s1379_s8] sm:$0xff] %vm879_vm4, %v878_v45 }
0x17c3   :  { %885 = vsyncpa [#allocation5], 1 }
0x17c4   :  { %886 = vsyncpa [#allocation7], 1 }

</bundles_post_ra>
